<compile_context>
chip_gen: v7x
topology: tpu7x:2x2x1
jax: 0.10.0
libtpu: 0.0.40
codegen_flags: <defaults>
</compile_context>

<pallas_src>
import functools

import jax
import jax.numpy as jnp
from jax import lax
from jax.experimental import pallas as pl
from jax.experimental.pallas import tpu as pltpu


def _static_pow(x, gamma):
    """x**gamma via repeated multiplies when gamma is a small non-negative int."""
    g = float(gamma)
    if g.is_integer() and 0.0 <= g <= 8.0:
        n = int(g)
        if n == 0:
            return jnp.ones_like(x)
        out = x
        for _ in range(n - 1):
            out = out * x
        return out
    return x ** g  # non-integer gamma: falls back to pow (exp/log on EUP)


def _focal_loss_kernel(x_ref, t_ref, acc_ref, *, gamma, alpha, rows_total,
                       mask_tail):
    blk = pl.program_id(1)  # inner ("arbitrary") reduction axis over row-blocks

    @pl.when(blk == 0)
    def _():
        acc_ref[...] = jnp.zeros_like(acc_ref)

    x = x_ref[...].astype(jnp.float32)                       # (C, TS, 128)
    c_dim, ts, lanes = x.shape
    t = t_ref[...].astype(jnp.float32).reshape(ts, lanes)    # (TS, 128)

    # softmax over the (leading, untiled) channel axis: elementwise VPU max/add
    m = x[0]
    for c in range(1, c_dim):
        m = jnp.maximum(m, x[c])

    e1 = jnp.exp(x[1] - m)               # exp for the positive class
    s = e1
    for c in range(c_dim):
        if c != 1:
            s = s + jnp.exp(x[c] - m)

    # logs straight from the logits: one shared log(s), no log(0) blowups
    log_s = jnp.log(s)
    log_p = (x[1] - m) - log_s                               # log softmax[:,1]
    s_rest = s - e1                                          # mass of other classes
    log_1mp = jnp.log(jnp.maximum(s_rest, 1e-30)) - log_s    # log(1 - p), clamped

    inv_s = pl.reciprocal(s, approx=True)  # EUP slot; frees VALU in the hot chain
    p = e1 * inv_s                       # softmax[:,1]
    omp = s_rest * inv_s                 # (1 - p) without cancellation

    w_pos = _static_pow(omp, gamma)      # (1-p)**gamma -> one multiply for gamma=2
    w_neg = _static_pow(p, gamma)        # p**gamma

    loss = (-alpha * w_pos * t * log_p
            - (1.0 - alpha) * w_neg * (1.0 - t) * log_1mp)   # (TS, 128)

    if mask_tail:
        # last row-block may read past the true extent (OOB rows are garbage):
        # zero their contribution with a cheap compare+select.
        row = lax.broadcasted_iota(jnp.int32, (ts, lanes), 0)
        loss = jnp.where(row < (rows_total - blk * ts), loss, 0.0)

    # vreg-shaped accumulation: fold (TS/8) vregs into the resident (8,128)
    # output block; the single cross-lane reduce happens once, in the wrapper.
    full = (ts // 8) * 8
    if full:
        acc_ref[...] += jnp.sum(loss[:full].reshape(full // 8, 8, lanes), axis=0)
    rem = ts - full
    if rem:
        acc_ref[...] += jnp.concatenate(
            [loss[full:], jnp.zeros((8 - rem, lanes), loss.dtype)], axis=0)


def focal_loss(x, target, *, gamma=2.0, alpha=0.25, size_average=True,
               x_block_cap_bytes=6 << 20):
    """Focal loss matching the PyTorch `Focal_Loss.forward`.

    x:      (N, C, H, W) logits, f32 or bf16 (streamed in the caller's dtype).
    target: the full (N, C, H, W) one-hot tensor (as in the PyTorch forward) or
            the pre-sliced channel-1 plane (N, H, W).  For the one-hot form,
            only the channel-1 plane is ever DMA'd from HBM.
    """
    N, C, H, W = x.shape
    assert C >= 2, "focal loss uses channel 1 as the positive class"
    HW = H * W
    L = N * HW
    R = pl.cdiv(HW, 128)
    pad = R * 128 - HW

    if pad == 0:
        # fast path: all reshapes are free (no HBM copies)
        x4 = x.reshape(N, C, R, 128)
        if target.ndim == 4:
            t_arr = target.reshape(N, C, R, 128)
            t_is_4d = True
        else:
            t_arr = target.reshape(N, R, 128)
            t_is_4d = False
    else:
        # TODO(synk): the H*W%128 tail could be masked in-kernel (lane iota) to
        # avoid this padded copy; only hit when H*W is not a multiple of 128.
        xf = x.reshape(N, C, HW)
        big = jnp.zeros((N, C, pad), x.dtype).at[:, 1, :].set(
            jnp.asarray(1e4, x.dtype))          # p==1, t==1 -> exactly zero loss
        x4 = jnp.concatenate([xf, big], axis=-1).reshape(N, C, R, 128)
        t_plane = target[:, 1, :, :] if target.ndim == 4 else target
        tf = t_plane.reshape(N, HW)
        t_arr = jnp.concatenate(
            [tf, jnp.ones((N, pad), tf.dtype)], axis=-1).reshape(N, R, 128)
        t_is_4d = False

    # tile size: as many rows as fit a ~6 MiB x-block (generation-safe for
    # v7x's smaller VMEM, near-roofline on v5e/v6e), multiple of 8 rows
    itemsize = jnp.dtype(x.dtype).itemsize
    bytes_per_row = C * 128 * itemsize
    cap_rows = max(8, (x_block_cap_bytes // bytes_per_row) // 8 * 8)
    ts_eff = R if R <= cap_rows else cap_rows
    n_blocks = pl.cdiv(R, ts_eff)
    mask_tail = (R % ts_eff) != 0

    x_spec = pl.BlockSpec((pl.Squeezed(), C, ts_eff, 128),
                          lambda n, b: (n, 0, b, 0))
    if t_is_4d:
        # pick channel 1 straight out of the one-hot via the index_map
        t_spec = pl.BlockSpec((pl.Squeezed(), 1, ts_eff, 128),
                              lambda n, b: (n, 1, b, 0))
    else:
        t_spec = pl.BlockSpec((pl.Squeezed(), ts_eff, 128),
                              lambda n, b: (n, b, 0))

    kernel = functools.partial(_focal_loss_kernel,
                               gamma=float(gamma), alpha=float(alpha),
                               rows_total=R, mask_tail=mask_tail)

    # per-batch (8,128) partial sums; output block doubles as accumulator
    partials = pl.pallas_call(
        kernel,
        out_shape=jax.ShapeDtypeStruct((N * 8, 128), jnp.float32),
        grid_spec=pltpu.PrefetchScalarGridSpec(
            num_scalar_prefetch=0,
            grid=(N, n_blocks),
            in_specs=[x_spec, t_spec],
            out_specs=pl.BlockSpec((8, 128), lambda n, b: (n, 0)),
        ),
        compiler_params=pltpu.CompilerParams(
            dimension_semantics=("parallel", "arbitrary"),
            vmem_limit_bytes=32 * 1024 * 1024),
    )(x4, t_arr)

    total = jnp.sum(partials)
    if size_average:
        return total / jnp.float32(L)
    return total


if __name__ == "__main__":
    key = jax.random.PRNGKey(0)
    kx, kt = jax.random.split(key)

    N, C, H, W = 2, 4, 16, 16
    x = jax.random.normal(kx, (N, C, H, W), dtype=jnp.float32)

    # one-hot target with the same NCHW shape (only channel 1 is used)
    labels = jax.random.randint(kt, (N, H, W), 0, C)
    target = jax.nn.one_hot(labels, C, axis=1, dtype=jnp.float32)  # (N, C, H, W)

    loss = focal_loss(x, target, gamma=2.0, alpha=0.25, size_average=True)
    loss = jax.block_until_ready(loss)

    # pure-JAX reference of the PyTorch forward
    pt = jax.nn.softmax(x, axis=1)
    p = pt[:, 1, :, :]
    t = target[:, 1, :, :]
    ref = (-0.25 * (1 - p) ** 2 * t * jnp.log(p)
           - 0.75 * p ** 2 * (1 - t) * jnp.log(1 - p)).mean()
    # tolerance covers the ~2^-12 approx-reciprocal used for the p / (1-p) weights
    assert jnp.allclose(loss, ref, rtol=2e-3, atol=1e-6), (loss, ref)

    print("KERNEL_OK")
</pallas_src>

<mosaic_0001>
module attributes {stable_mosaic.version = 11 : i64} {
  func.func @_focal_loss_kernel(%arg0: i32, %arg1: i32, %arg2: memref<1x4x2x128xf32, #tpu.memory_space<vmem>>, %arg3: memref<1x1x2x128xf32, #tpu.memory_space<vmem>>, %arg4: memref<8x128xf32, #tpu.memory_space<vmem>>) attributes {dimension_semantics = [#tpu.dimension_semantics<parallel>, #tpu.dimension_semantics<arbitrary>], iteration_bounds = array<i64: 2, 1>, scalar_prefetch = 0 : i64, scratch_operands = 0 : i64, tpu.core_type = #tpu.core_type<tc>, window_params = [{transform_indices = @transform_0, window_bounds = array<i64: 1, 4, 2, 128>}, {transform_indices = @transform_1, window_bounds = array<i64: 1, 1, 2, 128>}, {transform_indices = @transform_2, window_bounds = array<i64: 8, 128>}]} {
    %c0_i32 = arith.constant 0 : i32
    %0 = arith.cmpi eq, %arg1, %c0_i32 : i32
    %1 = arith.extui %0 : i1 to i32
    %c0_i32_0 = arith.constant 0 : i32
    %2 = arith.cmpi ne, %1, %c0_i32_0 : i32
    scf.if %2 {
      %cst_16 = arith.constant 0.000000e+00 : f32
      %69 = vector.broadcast %cst_16 : f32 to vector<8x128xf32>
      %c0_17 = arith.constant 0 : index
      %c0_18 = arith.constant 0 : index
      %70 = vector.load %arg4[%c0_17, %c0_18] : memref<8x128xf32, #tpu.memory_space<vmem>>, vector<8x128xf32>
      tpu.vector_store %arg4[%c0_17, %c0_18], %69 {strides = array<i32>} : memref<8x128xf32, #tpu.memory_space<vmem>>, vector<8x128xf32>,
    } else {
    }
    %c0 = arith.constant 0 : index
    %c0_1 = arith.constant 0 : index
    %c0_2 = arith.constant 0 : index
    %c0_3 = arith.constant 0 : index
    %3 = vector.load %arg2[%c0, %c0_1, %c0_2, %c0_3] : memref<1x4x2x128xf32, #tpu.memory_space<vmem>>, vector<1x4x2x128xf32>
    %4 = vector.shape_cast %3 : vector<1x4x2x128xf32> to vector<4x2x128xf32>
    %c0_4 = arith.constant 0 : index
    %c0_5 = arith.constant 0 : index
    %c0_6 = arith.constant 0 : index
    %c0_7 = arith.constant 0 : index
    %5 = vector.load %arg3[%c0_4, %c0_5, %c0_6, %c0_7] : memref<1x1x2x128xf32, #tpu.memory_space<vmem>>, vector<1x1x2x128xf32>
    %6 = vector.shape_cast %5 : vector<1x1x2x128xf32> to vector<1x2x128xf32>
    %7 = vector.shape_cast %6 : vector<1x2x128xf32> to vector<2x128xf32>
    %8 = vector.extract_strided_slice %4 {offsets = [0, 0, 0], sizes = [1, 2, 128], strides = [1, 1, 1]} : vector<4x2x128xf32> to vector<1x2x128xf32>
    %9 = vector.shape_cast %8 : vector<1x2x128xf32> to vector<2x128xf32>
    %10 = vector.extract_strided_slice %4 {offsets = [1, 0, 0], sizes = [1, 2, 128], strides = [1, 1, 1]} : vector<4x2x128xf32> to vector<1x2x128xf32>
    %11 = vector.shape_cast %10 : vector<1x2x128xf32> to vector<2x128xf32>
    %12 = arith.maximumf %9, %11 : vector<2x128xf32>
    %13 = vector.extract_strided_slice %4 {offsets = [2, 0, 0], sizes = [1, 2, 128], strides = [1, 1, 1]} : vector<4x2x128xf32> to vector<1x2x128xf32>
    %14 = vector.shape_cast %13 : vector<1x2x128xf32> to vector<2x128xf32>
    %15 = arith.maximumf %12, %14 : vector<2x128xf32>
    %16 = vector.extract_strided_slice %4 {offsets = [3, 0, 0], sizes = [1, 2, 128], strides = [1, 1, 1]} : vector<4x2x128xf32> to vector<1x2x128xf32>
    %17 = vector.shape_cast %16 : vector<1x2x128xf32> to vector<2x128xf32>
    %18 = arith.maximumf %15, %17 : vector<2x128xf32>
    %19 = vector.extract_strided_slice %4 {offsets = [1, 0, 0], sizes = [1, 2, 128], strides = [1, 1, 1]} : vector<4x2x128xf32> to vector<1x2x128xf32>
    %20 = vector.shape_cast %19 : vector<1x2x128xf32> to vector<2x128xf32>
    %21 = arith.subf %20, %18 : vector<2x128xf32>
    %22 = math.exp %21 : vector<2x128xf32>
    %23 = vector.extract_strided_slice %4 {offsets = [0, 0, 0], sizes = [1, 2, 128], strides = [1, 1, 1]} : vector<4x2x128xf32> to vector<1x2x128xf32>
    %24 = vector.shape_cast %23 : vector<1x2x128xf32> to vector<2x128xf32>
    %25 = arith.subf %24, %18 : vector<2x128xf32>
    %26 = math.exp %25 : vector<2x128xf32>
    %27 = arith.addf %22, %26 : vector<2x128xf32>
    %28 = vector.extract_strided_slice %4 {offsets = [2, 0, 0], sizes = [1, 2, 128], strides = [1, 1, 1]} : vector<4x2x128xf32> to vector<1x2x128xf32>
    %29 = vector.shape_cast %28 : vector<1x2x128xf32> to vector<2x128xf32>
    %30 = arith.subf %29, %18 : vector<2x128xf32>
    %31 = math.exp %30 : vector<2x128xf32>
    %32 = arith.addf %27, %31 : vector<2x128xf32>
    %33 = vector.extract_strided_slice %4 {offsets = [3, 0, 0], sizes = [1, 2, 128], strides = [1, 1, 1]} : vector<4x2x128xf32> to vector<1x2x128xf32>
    %34 = vector.shape_cast %33 : vector<1x2x128xf32> to vector<2x128xf32>
    %35 = arith.subf %34, %18 : vector<2x128xf32>
    %36 = math.exp %35 : vector<2x128xf32>
    %37 = arith.addf %32, %36 : vector<2x128xf32>
    %38 = math.log %37 : vector<2x128xf32>
    %39 = vector.extract_strided_slice %4 {offsets = [1, 0, 0], sizes = [1, 2, 128], strides = [1, 1, 1]} : vector<4x2x128xf32> to vector<1x2x128xf32>
    %40 = vector.shape_cast %39 : vector<1x2x128xf32> to vector<2x128xf32>
    %41 = arith.subf %40, %18 : vector<2x128xf32>
    %42 = arith.subf %41, %38 : vector<2x128xf32>
    %43 = arith.subf %37, %22 : vector<2x128xf32>
    %cst = arith.constant 1.000000e-30 : f32
    %44 = vector.broadcast %cst : f32 to vector<2x128xf32>
    %45 = arith.maximumf %43, %44 : vector<2x128xf32>
    %46 = math.log %45 : vector<2x128xf32>
    %47 = arith.subf %46, %38 : vector<2x128xf32>
    %48 = tpu.reciprocal %37 {approx = true} : vector<2x128xf32> -> vector<2x128xf32>
    %49 = arith.mulf %22, %48 : vector<2x128xf32>
    %50 = arith.mulf %43, %48 : vector<2x128xf32>
    %51 = arith.mulf %50, %50 : vector<2x128xf32>
    %52 = arith.mulf %49, %49 : vector<2x128xf32>
    %cst_8 = arith.constant -2.500000e-01 : f32
    %53 = vector.broadcast %cst_8 : f32 to vector<2x128xf32>
    %54 = arith.mulf %53, %51 : vector<2x128xf32>
    %55 = arith.mulf %54, %7 : vector<2x128xf32>
    %56 = arith.mulf %55, %42 : vector<2x128xf32>
    %cst_9 = arith.constant 7.500000e-01 : f32
    %57 = vector.broadcast %cst_9 : f32 to vector<2x128xf32>
    %58 = arith.mulf %57, %52 : vector<2x128xf32>
    %cst_10 = arith.constant 1.000000e+00 : f32
    %59 = vector.broadcast %cst_10 : f32 to vector<2x128xf32>
    %60 = arith.subf %59, %7 : vector<2x128xf32>
    %61 = arith.mulf %58, %60 : vector<2x128xf32>
    %62 = arith.mulf %61, %47 : vector<2x128xf32>
    %63 = arith.subf %56, %62 : vector<2x128xf32>
    %c0_11 = arith.constant 0 : index
    %c0_12 = arith.constant 0 : index
    %64 = vector.load %arg4[%c0_11, %c0_12] : memref<8x128xf32, #tpu.memory_space<vmem>>, vector<8x128xf32>
    %cst_13 = arith.constant 0.000000e+00 : f32
    %65 = vector.broadcast %cst_13 : f32 to vector<6x128xf32>
    %66 = tpu.concatenate %63, %65 in 0 : vector<2x128xf32>, vector<6x128xf32> -> vector<8x128xf32>
    %67 = arith.addf %64, %66 : vector<8x128xf32>
    %c0_14 = arith.constant 0 : index
    %c0_15 = arith.constant 0 : index
    %68 = vector.load %arg4[%c0_14, %c0_15] : memref<8x128xf32, #tpu.memory_space<vmem>>, vector<8x128xf32>
    tpu.vector_store %arg4[%c0_14, %c0_15], %67 {strides = array<i32>} : memref<8x128xf32, #tpu.memory_space<vmem>>, vector<8x128xf32>,
    return
  }
  func.func @transform_0(%arg0: i32, %arg1: i32) -> (i32, i32, i32, i32) {
    %c0_i32 = arith.constant 0 : i32
    %c0_i32_0 = arith.constant 0 : i32
    %c0_i32_1 = arith.constant 0 : i32
    return %arg0, %c0_i32, %arg1, %c0_i32_0 : i32, i32, i32, i32
  }
  func.func @transform_1(%arg0: i32, %arg1: i32) -> (i32, i32, i32, i32) {
    %c1_i32 = arith.constant 1 : i32
    %c0_i32 = arith.constant 0 : i32
    %c0_i32_0 = arith.constant 0 : i32
    return %arg0, %c1_i32, %arg1, %c0_i32 : i32, i32, i32, i32
  }
  func.func @transform_2(%arg0: i32, %arg1: i32) -> (i32, i32) {
    %c0_i32 = arith.constant 0 : i32
    %c0_i32_0 = arith.constant 0 : i32
    return %arg0, %c0_i32 : i32, i32
  }
}

</mosaic_0001>

<bundles_post_ra>
// kernel: tpu_custom_call.1
= control target key start
LH: loop header
LB: loop body
LE: loop exit
PB: predicated region body
PF: predicated region fallthrough
CT: control target
= control target key end

     0   :  { %7 = vsyncpa [#allocation3], 0  ;;  %s890_s0 = inlined_call_operand.hbm [shape: f32[2,4,2,128], index: 0, kind: input, shape index: {}]   ;;  %s891_s1 = inlined_call_operand.hbm [shape: f32[2,4,2,128], index: 1, kind: input, shape index: {}]   ;;  %s892_s2 = inlined_call_operand.hbm [shape: f32[16,128], index: 2, kind: output, shape index: {}]  }
   0x1   :  { %9 = vsyncpa [#allocation3 + $0x1], 0 }
   0x2   :  { %10 = vsyncpa [#allocation6], 0 }
   0x3   :  { %12 = vsyncpa [#allocation6 + $0x1], 0 }
   0x4   :  { %13 = vsyncpa [#allocation4], 0 }
   0x5   :  { %15 = vsyncpa [#allocation4 + $0x1], 0  ;;  %s666_s9 = smov 0   ;;  %s668_s10 = smov 0  }
   0x6   :  { %s670_s11 = smov 0   ;;  %s672_s12 = smov 0  }
   0x7   :  { %s674_s13 = smov 0   ;;  %s676_s14 = smov 0  }
   0x8 LB: > { %s393_s15 = sadd.s32 4294967295, %s644_s14   ;;  %s394_s16 = sadd.s32 4294967294, %s644_s14   ;;  %s644_s14 = sphi %s676_s14, %s21_s14   ;;  %s640_s13 = sphi %s674_s13, %s911_s13   ;;  %s636_s12 = sphi %s672_s12, %s910_s12   ;;  %s632_s11 = sphi %s670_s11, %s909_s11   ;;  %s628_s10 = sphi %s668_s10, %s908_s10   ;;  %s624_s9 = sphi %s666_s9, %s907_s9  }
   0x9   : > { %s33_s17 = sadd.s32 1, %s640_s13  ;;  %s42_s18 = sadd.s32 1, %s632_s11 }
   0xa   : > { %p35_p0 = scmp.ge.s32.totalorder %s33_s17, 2  ;;  %p49_p1 = scmp.ne.s32.totalorder %s632_s11, %s628_s10 }
   0xb   : > { %p50_p2 = scmp.eq.s32.totalorder %s644_s14, 0  ;;  %p55_p3 = scmp.ne.s32.totalorder %s628_s10, %s624_s9 }
   0xc   : > { %s913_s17 = smov (%p35_p0, %s33_s17), 0  ;;  %p56_p5 = scmp.eq.s32.totalorder %s393_s15, 0 }
   0xd   : > { %p707_p4 = por %p50_p2, %p49_p1  ;;  %s37_s20 = ssub.s32 %s640_s13, %s913_s17 }
   0xe   : > { %p107_p6 = scmp.eq.s32.totalorder %s393_s15, 1  ;;  %p40_p7 = scmp.eq.s32.totalorder %s37_s20, 0 }
   0xf   : > { %p713_p8 = por %p56_p5, %p55_p3  ;;  %p113_p10 = scmp.eq.s32.totalorder %s394_s16, 1 }
  0x10   : > { %p717_p9 = por %p107_p6, %p49_p1  ;;  %p430_p13 = scmp.lt.s32.totalorder %s644_s14, 2 }
  0x11   : > { %s896_s21 = scalar_select %p713_p8, 1, 0 }
  0x12   : > { %s897_s22 = scalar_select %p717_p9, 1, 0 }
  0x13   : > { %s722_s23 = scalar_select %p40_p7, %s632_s11, %s42_s18  }
  0x14   : > { %p724_p11 = por %p113_p10, %p55_p3  ;;  %s731_s25 = sand.u32 1, %s632_s11  }
  0x15   : > { %s397_s26 = sshll.u32 %s731_s25, 3  ;;  %s411_s27 = sshll.u32 %s640_s13, 7 }
  0x16   : > { %s898_s24 = scalar_select %p724_p11, 1, 0 }
  0x17   : > { %s740_s30 = scalar_lea.hbm %s890_s0, %s411_s27  ;;  %s137_s3 = scalar_lea.vmem [#allocation2], %s397_s26 }
  0x18   : > { %s145_s4 = sshll.u32 %s137_s3, 4  ;;  %p746_p0 = pnand %p430_p13, %p707_p4  ;;  %s742_s4 = int_to_ptr.vmem [resolvable:$true] %s145_s4 }
  0x19   : > { %s134_s6 = scalar_lea.sflag [#allocation3], %s731_s25  ;;  %s497_s7 = scalar_lea.hbm %s740_s30, 128 }
  0x1a   : > { %p498_p2 = scmp.ne.s32.totalorder %s740_s30, %s497_s7  ;;  %p499_p3 = pneg %p746_p0 }
  0x1b   : > { %s502_s16 = scalar_lea.hbm %s890_s0, 256  ;;  %p503_p4 = scmp.lt.u32.totalorder %s740_s30, %s890_s0 }
  0x1c   : > { %p500_p5 = pnand %p499_p3, %p498_p2  ;;  %p504_p7 = scmp.lt.u32.totalorder %s502_s16, %s497_s7 }
  0x1d   : > { %p506_p13 = scmp.lt.u32.totalorder %s497_s7, %s740_s30 }
  0x1e   : > { %p501_p6 = pneg %p500_p5  ;;  %p505_p10 = por %p504_p7, %p503_p4 }
  0x20   : > { %p507_p12 = por %p506_p13, %p505_p10 }
  0x22   : > { %p508_p1 = pnand %p507_p12, %p501_p6 }
  0x24   : > { %511 = shalt.err (!%p508_p1)
}
  0x25   : > { %s512_s20 = scalar_lea.vmem %s742_s4, 128  ;;  %s646_s26 = smov [#allocation2]  }
  0x26   : > { %p513_p2 = scmp.ne.s32.totalorder %s742_s4, %s512_s20  ;;  %s517_s28 = sshll.u32 %s646_s26, 4  ;;  %s518_s28 = int_to_ptr.vmem [resolvable:$false] %s517_s28 }
  0x27   : > { %s519_s29 = scalar_lea.vmem %s518_s28, 256  ;;  %p520_p9 = scmp.lt.s32.totalorder %s742_s4, %s518_s28 }
  0x28   : > { %p515_p5 = pnand %p513_p2, %p499_p3  ;;  %p521_p4 = scmp.lt.s32.totalorder %s519_s29, %s512_s20 }
  0x2a   : > { %p516_p11 = pneg %p515_p5  ;;  %p522_p7 = por %p521_p4, %p520_p9 }
  0x2c   : > { %p523_p10 = pnand %p522_p7, %p516_p11 }
  0x2e   : > { %526 = shalt.err (!%p523_p10)
}
  0x2f   : > { %s647_s3 = smov 32   ;;  %s648_s7 = smov 2  }
  0x30   : > { %422 = dma.hbm_to_vmem [thread:$0]  (!%p746_p0), %s740_s30, 128, %s742_s4, %s134_s6, %s647_s3, %s647_s3, %s648_s7  }
  0x31   : > { %p174_p12 = scmp.lt.s32.totalorder %s644_s14, 3  ;;  %s400_s8 = sshll.u32 %s731_s25, 1 }
  0x32   : > { %s327_s18 = scalar_lea.hbm %s891_s1, %s411_s27  ;;  %p900_p9 = scmp.ge.s32.totalorder %s644_s14, 1 }
  0x33   : > { %s792_s20 = scalar_lea.hbm %s327_s18, 32  ;;  %s159_s26 = scalar_lea.vmem [#allocation5], %s400_s8 }
  0x34   : > { %p788_p11 = pnand %p900_p9, %p174_p12  ;;  %s169_s28 = sshll.u32 %s159_s26, 4  ;;  %s170_s28 = int_to_ptr.vmem [resolvable:$true] %s169_s28 }
  0x35   : > { %s156_s30 = scalar_lea.sflag [#allocation6], %s731_s25  ;;  %s557_s4 = scalar_lea.hbm %s327_s18, 64 }
  0x36   : > { %s901_s19 = scalar_select %p788_p11, 1, 0 }
  0x37   : > { %p528_p1 = scmp.ne.s32.totalorder %s792_s20, %s557_s4  ;;  %s532_s29 = scalar_lea.hbm %s891_s1, 256 }
  0x38   : > { %p533_p2 = scmp.lt.u32.totalorder %s792_s20, %s891_s1  ;;  %p534_p5 = scmp.lt.u32.totalorder %s532_s29, %s557_s4 }
  0x39   : > { %p530_p6 = pnand %p528_p1, %p499_p3  ;;  %p536_p7 = scmp.lt.u32.totalorder %s557_s4, %s792_s20 }
  0x3a   : > { %p535_p4 = por %p534_p5, %p533_p2 }
  0x3b   : > { %p531_p13 = pneg %p530_p6 }
  0x3c   : > { %p537_p10 = por %p536_p7, %p535_p4 }
  0x3e   : > { %p538_p12 = pnand %p537_p10, %p531_p13 }
  0x40   : > { %541 = shalt.err (!%p538_p12)
}
  0x41   : > { %s542_s25 = scalar_lea.vmem %s170_s28, 32  ;;  %s649_s8 = smov [#allocation5]  }
  0x42   : > { %p543_p9 = scmp.ne.s32.totalorder %s170_s28, %s542_s25  ;;  %s547_s15 = sshll.u32 %s649_s8, 4  ;;  %s548_s15 = int_to_ptr.vmem [resolvable:$false] %s547_s15 }
  0x43   : > { %s549_s16 = scalar_lea.vmem %s548_s15, 64  ;;  %p550_p8 = scmp.lt.s32.totalorder %s170_s28, %s548_s15 }
  0x44   : > { %p545_p1 = pnand %p543_p9, %p499_p3  ;;  %p551_p11 = scmp.lt.s32.totalorder %s549_s16, %s542_s25 }
  0x46   : > { %p546_p6 = pneg %p545_p1  ;;  %p552_p2 = por %p551_p11, %p550_p8 }
  0x48   : > { %p553_p5 = pnand %p552_p2, %p546_p6 }
  0x4a   : > { %556 = shalt.err (!%p553_p5)
}
  0x4b   : > { %425 = dma.hbm_to_vmem [thread:$0]  (!%p746_p0), %s792_s20, 32, %s170_s28, %s156_s30  }
  0x4c   : > { %p902_p13 = scmp.ne.s32.totalorder %s901_s19, 0 }
  0x4d   : > { %s816_s18 = sand.u32 (!%p902_p13), 1, %s628_s10   ;;  %p903_p8 = scmp.ne.s32.totalorder (!%p902_p13), %s896_s21, 0 }
  0x4e   : > { %178 = sbr.rel (%p902_p13) target bundleno = 157 (0x9d), region = 28  ;;  %s404_s26 = sshll.u32 (!%p902_p13), %s816_s18, 3 }
  0x4f   : > { %s181_s4 = scalar_lea.sflag (!%p902_p13), [#allocation3], %s816_s18  ;;  %s184_s27 = scalar_lea.vmem (!%p902_p13), [#allocation2], %s404_s26 }
  0x55   : > { %611 = dma.done.wait (%p903_p8), %s181_s4, 128  }
  0x56   : > { %613 = vsyncadd (%p903_p8), %s181_s4, 4294967168  ;;  %s405_s5 = sshll.u32 %s816_s18, 1  ;;  %s190_s19 = scalar_lea.sflag [#allocation6], %s816_s18 }
  0x57   : > { %s828_s20 = scalar_lea.vmem [#allocation5], %s405_s5 }
  0x58   : > { %615 = dma.done.wait (%p903_p8), %s190_s19, 32  }
  0x59   : > { %617 = vsyncadd (%p903_p8), %s190_s19, 4294967264  ;;  %v224_v0 = vld [vmem:[%s184_s27] sm:$0x3]  ;;  %v225_v1 = vld [vmem:[%s184_s27 + $0x2] sm:$0x3]  ;;  %vm269_vm0 = vcmask 1041408  }
  0x5a   : > { %v226_v2 = vld [vmem:[%s184_s27 + $0x4] sm:$0x3]  ;;  %v229_v3 = vmax.f32 %v224_v0, %v225_v1  ;;  %v227_v4 = vld [vmem:[%s184_s27 + $0x6] sm:$0x3]  ;;  %v228_v26 = vld [vmem:[%s828_s20] sm:$0x3] }
  0x5b   : > { %v264_v33 = vsub.f32 1.0, %v228_v26  ;;  %s408_s21 = sshll.u32 %s636_s12, 7  ;;  %s218_s28 = scalar_lea.vmem [#allocation7], %s404_s26 }
  0x5c   : > { %v230_v5 = vmax.f32 %v229_v3, %v226_v2  ;;  %s287_s30 = sshll.u32 %s218_s28, 4  ;;  %s841_s3 = scalar_lea.hbm %s892_s2, %s408_s21  ;;  %s843_s30 = int_to_ptr.vmem [resolvable:$true] %s287_s30 }
  0x5d   : > { %s274_s7 = scalar_lea.sflag [#allocation4], %s816_s18  ;;  %s558_s25 = scalar_lea.vmem %s843_s30, 128 }
  0x5e   : > { %v231_v6 = vmax.f32 %v230_v5, %v227_v4  ;;  %p559_p0 = scmp.ne.s32.totalorder %s843_s30, %s558_s25  ;;  %p904_p3 = scmp.ne.s32.totalorder %s897_s22, 0 }
  0x5f   : > { %s650_s12 = smov [#allocation7]  }
  0x60   : > { %v232_v7 = vsub.f32 %v225_v1, %v231_v6  ;;  %v235_v8 = vsub.f32 %v224_v0, %v231_v6  ;;  %v239_v9 = vsub.f32 %v226_v2, %v231_v6  ;;  %v243_v10 = vsub.f32 %v227_v4, %v231_v6  ;;  %p560_p11 = pnand %p559_p0, %p904_p3  ;;  %s562_s8 = sshll.u32 %s650_s12, 4  ;;  %s563_s8 = int_to_ptr.vmem [resolvable:$false] %s562_s8 }
  0x61   : > { %s564_s15 = scalar_lea.vmem %s563_s8, 256  ;;  %p565_p7 = scmp.lt.s32.totalorder %s843_s30, %s563_s8 }
  0x62   : > { %v233_v11 = vmul.f32 1.442695, %v232_v7  ;;  %v236_v12 = vmul.f32 1.442695, %v235_v8  ;;  %v240_v13 = vmul.f32 1.442695, %v239_v9  ;;  %p561_p4 = pneg %p560_p11  ;;  %p566_p10 = scmp.lt.s32.totalorder %s564_s15, %s558_s25 }
  0x63   : > { %v244_v14 = vmul.f32 1.442695, %v243_v10 }
  0x64   : > { %483 = vpow2.f32 %v233_v11  ;;  %p567_p12 = por %p566_p10, %p565_p7 }
  0x65   : > { %485 = vpow2.f32 %v236_v12 }
  0x66   : > { %487 = vpow2.f32 %v240_v13  ;;  %p568_p9 = pnand %p567_p12, %p561_p4 }
  0x67   : > { %489 = vpow2.f32 %v244_v14 }
  0x6e   : > { %v484_v15 = vpop.eup %483 }
  0x6f   : > { %v486_v16 = vpop.eup %485 }
  0x70   : > { %v488_v17 = vpop.eup %487  ;;  %v238_v18 = vadd.f32 %v486_v16, %v484_v15 }
  0x71   : > { %v490_v19 = vpop.eup %489 }
  0x72   : > { %v242_v20 = vadd.f32 %v488_v17, %v238_v18 }
  0x74   : > { %v246_v21 = vadd.f32 %v490_v19, %v242_v20 }
  0x76   : > { %491 = vlog2.f32 %v246_v21  ;;  %v250_v22 = vsub.f32 %v246_v21, %v484_v15 }
  0x77   : > { %493 = vrcp.f32 %v246_v21 }
  0x78   : > { %v251_v23 = vmax.f32 %v250_v22, 1e-30 }
  0x7a   : > { %495 = vlog2.f32 %v251_v23 }
  0x80   : > { %v492_v24 = vpop.eup %491 }
  0x81   : > { %v494_v25 = vpop.eup %493  ;;  %v248_v27 = vmul.f32 0.6931472, %v492_v24 }
  0x82   : > { %v256_v28 = vmul.f32 %v494_v25, %v484_v15  ;;  %v257_v29 = vmul.f32 %v494_v25, %v250_v22 }
  0x83   : > { %v249_v35 = vsub.f32 %v232_v7, %v248_v27 }
  0x84   : > { %v496_v30 = vpop.eup %495  ;;  %v258_v31 = vmul.f32 %v257_v29, %v257_v29  ;;  %v259_v32 = vmul.f32 %v256_v28, %v256_v28 }
  0x85   : > { %v253_v34 = vmul.f32 0.6931472, %v496_v30 }
  0x86   : > { %v260_v36 = vmul.f32 -0.25, %v258_v31  ;;  %v263_v37 = vmul.f32 0.75, %v259_v32 }
  0x87   : > { %v254_v38 = vsub.f32 %v253_v34, %v248_v27 }
  0x88   : > { %v261_v39 = vmul.f32 %v260_v36, %v228_v26  ;;  %v265_v40 = vmul.f32 %v264_v33, %v263_v37 }
  0x8a   : > { %v262_v41 = vmul.f32 %v261_v39, %v249_v35  ;;  %v266_v42 = vmul.f32 %v265_v40, %v254_v38 }
  0x8c   : > { %v267_v43 = vsub.f32 %v262_v41, %v266_v42 }
  0x8e   : > { %v270_v44 = vsel %vm269_vm0, %v267_v43, 0.0 }
  0x8f   : > { %272 = vst [vmem:[%s218_s28] sm:$0xff] %v270_v44 }
  0x90   : > { %571 = shalt.err (!%p568_p9)
}
  0x91   : > { %s572_s16 = scalar_lea.hbm %s841_s3, 128  ;;  %s576_s4 = scalar_lea.hbm %s892_s2, 256 }
  0x92   : > { %p573_p1 = scmp.ne.s32.totalorder %s841_s3, %s572_s16  ;;  %p577_p5 = scmp.lt.u32.totalorder %s841_s3, %s892_s2 }
  0x93   : > { %p578_p13 = scmp.lt.u32.totalorder %s576_s4, %s572_s16  ;;  %p580_p0 = scmp.lt.u32.totalorder %s572_s16, %s841_s3 }
  0x94   : > { %p574_p6 = pnand %p573_p1, %p904_p3 }
  0x95   : > { %p579_p8 = por %p578_p13, %p577_p5 }
  0x96   : > { %p575_p2 = pneg %p574_p6 }
  0x97   : > { %p581_p11 = por %p580_p0, %p579_p8 }
  0x99   : > { %p582_p4 = pnand %p581_p11, %p575_p2 }
  0x9b   : > { %585 = shalt.err (!%p582_p4)
}
  0x9c   : > { %417 = dma.vmem_to_hbm [thread:$0]  (%p904_p3), %s843_s30, 128, %s841_s3, %s274_s7  }
  0x9d PF: > { %s299_s19 = sand.u32 1, %s624_s9   ;;  %p905_p7 = scmp.ne.s32.totalorder %s898_s24, 0 }
  0x9e   : > { %p906_p10 = scmp.ge.s32.totalorder %s644_s14, 2  ;;  %s300_s20 = scalar_lea.sflag [#allocation4], %s299_s19 }
  0xa0   : > { %p427_p12 = pnand %p906_p10, %p905_p7 }
  0xa2   : > { %619 = dma.done.wait (!%p427_p12), %s300_s20, 128  }
  0xa3   : > { %621 = vsyncadd (!%p427_p12), %s300_s20, 4294967168  ;;  %s21_s14 = sadd.s32 1, %s644_s14   ;;  %s907_s9 = smov %s628_s10 }
  0xa4   : > { %p18_p9 = scmp.ge.s32.totalorder %s21_s14, 4   ;;  %s908_s10 = smov %s632_s11 }
  0xa5   : > { %s909_s11 = smov %s722_s23  ;;  %s910_s12 = smov %s640_s13 }
  0xa6   : > { %s911_s13 = smov %s913_s17  ;;  %20 = sbr.rel (!%p18_p9) target bundleno = 8 (0x8), region = 90 }
  0xad   :  { %305 = vsyncpa [#allocation3], 1 }
  0xae   :  { %307 = vsyncpa [#allocation3 + $0x1], 1 }
  0xaf   :  { %308 = vsyncpa [#allocation6], 1 }
  0xb0   :  { %310 = vsyncpa [#allocation6 + $0x1], 1 }
  0xb1   :  { %311 = vsyncpa [#allocation4], 1 }
  0xb2   :  { %313 = vsyncpa [#allocation4 + $0x1], 1 }

</bundles_post_ra>
